<compile_context>
chip_gen: v7x
topology: tpu7x:2x2x1
jax: 0.10.0
libtpu: 0.0.40
codegen_flags: <defaults>
</compile_context>

<pallas_src>
import functools

import jax
import jax.numpy as jnp
from jax.experimental import pallas as pl
from jax.experimental.pallas import tpu as pltpu


def rnn_fc_kernel(x_ref, rec_ref, fc_ref, out_ref):
    """x_ref:   (B, S*H)        flat input, one timestep per H-wide lane chunk
       rec_ref: (4H + 2, H)     [W_ih0^T; W_hh0^T; W_ih1^T; W_hh1^T; b0; b1]
       fc_ref:  (H + 1, NCP)    [W_fc^T (lane-padded); b_fc]
       out_ref: (B, NCP)        logits (lane-padded class dim)."""
    B, SH = x_ref.shape
    H = rec_ref.shape[1]
    S = SH // H
    NCP = out_ref.shape[1]

    # --- unpack the packed slabs (static, sublane-aligned slices; loaded once) ---
    w_ih0 = rec_ref[0 * H:1 * H, :]          # (H, H) = W_ih0^T
    w_hh0 = rec_ref[1 * H:2 * H, :]          # (H, H) = W_hh0^T
    w_ih1 = rec_ref[2 * H:3 * H, :]          # (H, H) = W_ih1^T
    w_hh1 = rec_ref[3 * H:4 * H, :]          # (H, H) = W_hh1^T
    biases = rec_ref[4 * H:4 * H + 2, :]     # (2, H): row0 = b_ih0+b_hh0, row1 = b_ih1+b_hh1
    w_fc = fc_ref[0:H, :]                    # (H, NCP)
    b_fc = fc_ref[H:H + 1, :]                # (1, NCP)

    # Bias broadcasts hoisted out of the unrolled recurrence (JAX won't CSE them).
    b0b = jnp.broadcast_to(biases[0:1, :], (B, H))
    b1b = jnp.broadcast_to(biases[1:2, :], (B, H))

    x_all = x_ref[...]                       # (B, S*H)

    # --- layer-0 input projection: h-independent, so hoisted off the serial chain ---
    pre0 = [
        jnp.dot(x_all[:, t * H:(t + 1) * H], w_ih0,
                preferred_element_type=jnp.float32) + b0b
        for t in range(S)
    ]

    # --- serial tanh recurrence, fully unrolled (S is small & static) ---
    # t = 0 peeled: hidden states start at zero, so the W_hh terms vanish.
    h0 = jnp.tanh(pre0[0])
    h1 = jnp.tanh(jnp.dot(h0, w_ih1, preferred_element_type=jnp.float32) + b1b)
    for t in range(1, S):
        h0 = jnp.tanh(pre0[t] +
                      jnp.dot(h0, w_hh0, preferred_element_type=jnp.float32))
        h1 = jnp.tanh(jnp.dot(h0, w_ih1, preferred_element_type=jnp.float32) +
                      jnp.dot(h1, w_hh1, preferred_element_type=jnp.float32) +
                      b1b)

    # --- final Linear on the last timestep's layer-1 hidden state ---
    out_ref[...] = (jnp.dot(h1, w_fc, preferred_element_type=jnp.float32) +
                    b_fc).astype(out_ref.dtype)


def prepare_custom_net_params(params, *, hidden_size, num_classes):
    """One-time (parameter-load-time) reformatting into two packed kernel slabs."""
    H = hidden_size
    NC = num_classes
    assert H % 8 == 0, "hidden_size must be sublane-aligned"
    NCP = ((NC + 127) // 128) * 128          # lane-align the class dim

    rec_slab = jnp.concatenate(
        [
            params["w_ih0"].T, params["w_hh0"].T,          # layer 0
            params["w_ih1"].T, params["w_hh1"].T,          # layer 1
            (params["b_ih0"] + params["b_hh0"]).reshape(1, H),   # folded b0
            (params["b_ih1"] + params["b_hh1"]).reshape(1, H),   # folded b1
        ],
        axis=0,
    ).astype(jnp.float32)                                   # (4H + 2, H)

    fc_slab = jnp.concatenate(
        [
            jnp.pad(params["w_fc"].T, ((0, 0), (0, NCP - NC))),
            jnp.pad(params["b_fc"], (0, NCP - NC)).reshape(1, NCP),
        ],
        axis=0,
    ).astype(jnp.float32)                                   # (H + 1, NCP)

    return rec_slab, fc_slab


def custom_net_forward(x, rec_slab, fc_slab, *, hidden_size, num_classes):
    """Mirrors CustomNet.forward: x.view(B, -1, H) -> 2-layer tanh RNN -> fc(out[:, -1])."""
    B = x.shape[0]
    x2 = x.reshape(B, -1).astype(jnp.float32)               # (B, S*H)
    NCP = fc_slab.shape[1]

    vmem = lambda: pl.BlockSpec(memory_space=pltpu.MemorySpace.VMEM)
    out_padded = pl.pallas_call(
        rnn_fc_kernel,
        out_shape=jax.ShapeDtypeStruct((B, NCP), jnp.float32),
        in_specs=[vmem(), vmem(), vmem()],
        out_specs=vmem(),
    )(x2, rec_slab, fc_slab)

    return out_padded[:, :num_classes]


def ref_forward(x_flat, params, *, hidden_size):
    """Pure-JAX reference mirroring PyTorch nn.RNN (tanh, 2 layers) + Linear."""
    B = x_flat.shape[0]
    H = hidden_size
    x = x_flat.reshape(B, -1, H)
    S = x.shape[1]
    h0 = jnp.zeros((B, H), jnp.float32)
    h1 = jnp.zeros((B, H), jnp.float32)
    for t in range(S):
        xt = x[:, t, :]
        h0 = jnp.tanh(xt @ params["w_ih0"].T + params["b_ih0"]
                      + h0 @ params["w_hh0"].T + params["b_hh0"])
        h1 = jnp.tanh(h0 @ params["w_ih1"].T + params["b_ih1"]
                      + h1 @ params["w_hh1"].T + params["b_hh1"])
    return h1 @ params["w_fc"].T + params["b_fc"]


if __name__ == "__main__":
    # Small shapes consistent with the module: input_size == hidden_size == 128,
    # num_layers = 2, num_classes = 10, batch = 2, seq derived from the view = 4.
    B, S, H, NC = 2, 4, 128, 10

    key = jax.random.PRNGKey(0)
    ks = jax.random.split(key, 10)
    scale = 1.0 / jnp.sqrt(H)
    params = {
        "w_ih0": jax.random.uniform(ks[0], (H, H), jnp.float32, -scale, scale),
        "w_hh0": jax.random.uniform(ks[1], (H, H), jnp.float32, -scale, scale),
        "b_ih0": jax.random.uniform(ks[2], (H,), jnp.float32, -scale, scale),
        "b_hh0": jax.random.uniform(ks[3], (H,), jnp.float32, -scale, scale),
        "w_ih1": jax.random.uniform(ks[4], (H, H), jnp.float32, -scale, scale),
        "w_hh1": jax.random.uniform(ks[5], (H, H), jnp.float32, -scale, scale),
        "b_ih1": jax.random.uniform(ks[6], (H,), jnp.float32, -scale, scale),
        "b_hh1": jax.random.uniform(ks[7], (H,), jnp.float32, -scale, scale),
        "w_fc": jax.random.uniform(ks[8], (NC, H), jnp.float32, -scale, scale),
        "b_fc": jax.random.uniform(ks[9], (NC,), jnp.float32, -scale, scale),
    }

    x = jax.random.normal(jax.random.PRNGKey(1), (B, S * H), jnp.float32)

    # One-time parameter packing (parameter-load time, not per forward call).
    rec_slab, fc_slab = prepare_custom_net_params(params, hidden_size=H, num_classes=NC)
    rec_slab, fc_slab = jax.block_until_ready((rec_slab, fc_slab))

    fwd = jax.jit(functools.partial(custom_net_forward, hidden_size=H, num_classes=NC))
    out = jax.block_until_ready(fwd(x, rec_slab, fc_slab))

    ref = ref_forward(x, params, hidden_size=H)
    assert out.shape == (B, NC), out.shape
    assert jnp.allclose(out, ref, atol=1e-4, rtol=1e-4), (out, ref)

    print("KERNEL_OK")
</pallas_src>

<mosaic_0001>
module attributes {stable_mosaic.version = 11 : i64} {
  func.func @rnn_fc_kernel(%arg0: memref<2x512xf32, #tpu.memory_space<vmem>>, %arg1: memref<514x128xf32, #tpu.memory_space<vmem>>, %arg2: memref<129x128xf32, #tpu.memory_space<vmem>>, %arg3: memref<2x128xf32, #tpu.memory_space<vmem>>) attributes {dimension_semantics = [], scalar_prefetch = 0 : i64, scratch_operands = 0 : i64, tpu.core_type = #tpu.core_type<tc>} {
    %c0 = arith.constant 0 : index
    %c0_0 = arith.constant 0 : index
    %0 = vector.load %arg1[%c0, %c0_0] : memref<514x128xf32, #tpu.memory_space<vmem>>, vector<128x128xf32>
    %c128 = arith.constant 128 : index
    %c0_1 = arith.constant 0 : index
    %1 = vector.load %arg1[%c128, %c0_1] : memref<514x128xf32, #tpu.memory_space<vmem>>, vector<128x128xf32>
    %c256 = arith.constant 256 : index
    %c0_2 = arith.constant 0 : index
    %2 = vector.load %arg1[%c256, %c0_2] : memref<514x128xf32, #tpu.memory_space<vmem>>, vector<128x128xf32>
    %c384 = arith.constant 384 : index
    %c0_3 = arith.constant 0 : index
    %3 = vector.load %arg1[%c384, %c0_3] : memref<514x128xf32, #tpu.memory_space<vmem>>, vector<128x128xf32>
    %c512 = arith.constant 512 : index
    %c0_4 = arith.constant 0 : index
    %4 = vector.load %arg1[%c512, %c0_4] : memref<514x128xf32, #tpu.memory_space<vmem>>, vector<2x128xf32>
    %c0_5 = arith.constant 0 : index
    %c0_6 = arith.constant 0 : index
    %5 = vector.load %arg2[%c0_5, %c0_6] : memref<129x128xf32, #tpu.memory_space<vmem>>, vector<128x128xf32>
    %c128_7 = arith.constant 128 : index
    %c0_8 = arith.constant 0 : index
    %6 = vector.load %arg2[%c128_7, %c0_8] : memref<129x128xf32, #tpu.memory_space<vmem>>, vector<1x128xf32>
    %7 = vector.extract_strided_slice %4 {offsets = [0, 0], sizes = [1, 128], strides = [1, 1]} : vector<2x128xf32> to vector<1x128xf32>
    %8 = vector.shape_cast %7 : vector<1x128xf32> to vector<1x128xf32>
    %9 = vector.broadcast %8 : vector<1x128xf32> to vector<2x128xf32>
    %10 = vector.extract_strided_slice %4 {offsets = [1, 0], sizes = [1, 128], strides = [1, 1]} : vector<2x128xf32> to vector<1x128xf32>
    %11 = vector.shape_cast %10 : vector<1x128xf32> to vector<1x128xf32>
    %12 = vector.broadcast %11 : vector<1x128xf32> to vector<2x128xf32>
    %c0_9 = arith.constant 0 : index
    %c0_10 = arith.constant 0 : index
    %13 = vector.load %arg0[%c0_9, %c0_10] : memref<2x512xf32, #tpu.memory_space<vmem>>, vector<2x512xf32>
    %14 = vector.extract_strided_slice %13 {offsets = [0, 0], sizes = [2, 128], strides = [1, 1]} : vector<2x512xf32> to vector<2x128xf32>
    %cst = arith.constant dense<0.000000e+00> : vector<2x128xf32>
    %15 = tpu.matmul %14, %0, %cst {dimension_numbers = #tpu.dot_dimension_numbers<[1], [0], [0], [1], [0, 0, 1, 1], [], []>} : vector<2x128xf32>, vector<128x128xf32>, vector<2x128xf32> -> vector<2x128xf32>
    %16 = arith.addf %15, %9 : vector<2x128xf32>
    %17 = vector.extract_strided_slice %13 {offsets = [0, 128], sizes = [2, 128], strides = [1, 1]} : vector<2x512xf32> to vector<2x128xf32>
    %cst_11 = arith.constant dense<0.000000e+00> : vector<2x128xf32>
    %18 = tpu.matmul %17, %0, %cst_11 {dimension_numbers = #tpu.dot_dimension_numbers<[1], [0], [0], [1], [0, 0, 1, 1], [], []>} : vector<2x128xf32>, vector<128x128xf32>, vector<2x128xf32> -> vector<2x128xf32>
    %19 = arith.addf %18, %9 : vector<2x128xf32>
    %20 = vector.extract_strided_slice %13 {offsets = [0, 256], sizes = [2, 128], strides = [1, 1]} : vector<2x512xf32> to vector<2x128xf32>
    %cst_12 = arith.constant dense<0.000000e+00> : vector<2x128xf32>
    %21 = tpu.matmul %20, %0, %cst_12 {dimension_numbers = #tpu.dot_dimension_numbers<[1], [0], [0], [1], [0, 0, 1, 1], [], []>} : vector<2x128xf32>, vector<128x128xf32>, vector<2x128xf32> -> vector<2x128xf32>
    %22 = arith.addf %21, %9 : vector<2x128xf32>
    %23 = vector.extract_strided_slice %13 {offsets = [0, 384], sizes = [2, 128], strides = [1, 1]} : vector<2x512xf32> to vector<2x128xf32>
    %cst_13 = arith.constant dense<0.000000e+00> : vector<2x128xf32>
    %24 = tpu.matmul %23, %0, %cst_13 {dimension_numbers = #tpu.dot_dimension_numbers<[1], [0], [0], [1], [0, 0, 1, 1], [], []>} : vector<2x128xf32>, vector<128x128xf32>, vector<2x128xf32> -> vector<2x128xf32>
    %25 = arith.addf %24, %9 : vector<2x128xf32>
    %26 = math.tanh %16 : vector<2x128xf32>
    %cst_14 = arith.constant dense<0.000000e+00> : vector<2x128xf32>
    %27 = tpu.matmul %26, %2, %cst_14 {dimension_numbers = #tpu.dot_dimension_numbers<[1], [0], [0], [1], [0, 0, 1, 1], [], []>} : vector<2x128xf32>, vector<128x128xf32>, vector<2x128xf32> -> vector<2x128xf32>
    %28 = arith.addf %27, %12 : vector<2x128xf32>
    %29 = math.tanh %28 : vector<2x128xf32>
    %cst_15 = arith.constant dense<0.000000e+00> : vector<2x128xf32>
    %30 = tpu.matmul %26, %1, %cst_15 {dimension_numbers = #tpu.dot_dimension_numbers<[1], [0], [0], [1], [0, 0, 1, 1], [], []>} : vector<2x128xf32>, vector<128x128xf32>, vector<2x128xf32> -> vector<2x128xf32>
    %31 = arith.addf %19, %30 : vector<2x128xf32>
    %32 = math.tanh %31 : vector<2x128xf32>
    %cst_16 = arith.constant dense<0.000000e+00> : vector<2x128xf32>
    %33 = tpu.matmul %32, %2, %cst_16 {dimension_numbers = #tpu.dot_dimension_numbers<[1], [0], [0], [1], [0, 0, 1, 1], [], []>} : vector<2x128xf32>, vector<128x128xf32>, vector<2x128xf32> -> vector<2x128xf32>
    %cst_17 = arith.constant dense<0.000000e+00> : vector<2x128xf32>
    %34 = tpu.matmul %29, %3, %cst_17 {dimension_numbers = #tpu.dot_dimension_numbers<[1], [0], [0], [1], [0, 0, 1, 1], [], []>} : vector<2x128xf32>, vector<128x128xf32>, vector<2x128xf32> -> vector<2x128xf32>
    %35 = arith.addf %33, %34 : vector<2x128xf32>
    %36 = arith.addf %35, %12 : vector<2x128xf32>
    %37 = math.tanh %36 : vector<2x128xf32>
    %cst_18 = arith.constant dense<0.000000e+00> : vector<2x128xf32>
    %38 = tpu.matmul %32, %1, %cst_18 {dimension_numbers = #tpu.dot_dimension_numbers<[1], [0], [0], [1], [0, 0, 1, 1], [], []>} : vector<2x128xf32>, vector<128x128xf32>, vector<2x128xf32> -> vector<2x128xf32>
    %39 = arith.addf %22, %38 : vector<2x128xf32>
    %40 = math.tanh %39 : vector<2x128xf32>
    %cst_19 = arith.constant dense<0.000000e+00> : vector<2x128xf32>
    %41 = tpu.matmul %40, %2, %cst_19 {dimension_numbers = #tpu.dot_dimension_numbers<[1], [0], [0], [1], [0, 0, 1, 1], [], []>} : vector<2x128xf32>, vector<128x128xf32>, vector<2x128xf32> -> vector<2x128xf32>
    %cst_20 = arith.constant dense<0.000000e+00> : vector<2x128xf32>
    %42 = tpu.matmul %37, %3, %cst_20 {dimension_numbers = #tpu.dot_dimension_numbers<[1], [0], [0], [1], [0, 0, 1, 1], [], []>} : vector<2x128xf32>, vector<128x128xf32>, vector<2x128xf32> -> vector<2x128xf32>
    %43 = arith.addf %41, %42 : vector<2x128xf32>
    %44 = arith.addf %43, %12 : vector<2x128xf32>
    %45 = math.tanh %44 : vector<2x128xf32>
    %cst_21 = arith.constant dense<0.000000e+00> : vector<2x128xf32>
    %46 = tpu.matmul %40, %1, %cst_21 {dimension_numbers = #tpu.dot_dimension_numbers<[1], [0], [0], [1], [0, 0, 1, 1], [], []>} : vector<2x128xf32>, vector<128x128xf32>, vector<2x128xf32> -> vector<2x128xf32>
    %47 = arith.addf %25, %46 : vector<2x128xf32>
    %48 = math.tanh %47 : vector<2x128xf32>
    %cst_22 = arith.constant dense<0.000000e+00> : vector<2x128xf32>
    %49 = tpu.matmul %48, %2, %cst_22 {dimension_numbers = #tpu.dot_dimension_numbers<[1], [0], [0], [1], [0, 0, 1, 1], [], []>} : vector<2x128xf32>, vector<128x128xf32>, vector<2x128xf32> -> vector<2x128xf32>
    %cst_23 = arith.constant dense<0.000000e+00> : vector<2x128xf32>
    %50 = tpu.matmul %45, %3, %cst_23 {dimension_numbers = #tpu.dot_dimension_numbers<[1], [0], [0], [1], [0, 0, 1, 1], [], []>} : vector<2x128xf32>, vector<128x128xf32>, vector<2x128xf32> -> vector<2x128xf32>
    %51 = arith.addf %49, %50 : vector<2x128xf32>
    %52 = arith.addf %51, %12 : vector<2x128xf32>
    %53 = math.tanh %52 : vector<2x128xf32>
    %cst_24 = arith.constant dense<0.000000e+00> : vector<2x128xf32>
    %54 = tpu.matmul %53, %5, %cst_24 {dimension_numbers = #tpu.dot_dimension_numbers<[1], [0], [0], [1], [0, 0, 1, 1], [], []>} : vector<2x128xf32>, vector<128x128xf32>, vector<2x128xf32> -> vector<2x128xf32>
    %55 = vector.broadcast %6 : vector<1x128xf32> to vector<2x128xf32>
    %56 = arith.addf %54, %55 : vector<2x128xf32>
    %c0_25 = arith.constant 0 : index
    %c0_26 = arith.constant 0 : index
    %57 = vector.load %arg3[%c0_25, %c0_26] : memref<2x128xf32, #tpu.memory_space<vmem>>, vector<2x128xf32>
    tpu.vector_store %arg3[%c0_25, %c0_26], %56 {strides = array<i32>} : memref<2x128xf32, #tpu.memory_space<vmem>>, vector<2x128xf32>,
    return
  }
}

</mosaic_0001>

<bundles_post_ra>
// kernel: custom_net_forward.1
= control target key start
LH: loop header
LB: loop body
LE: loop exit
PB: predicated region body
PF: predicated region fallthrough
CT: control target
= control target key end

     0   :  { %8 = vsyncpa [#allocation3], 0  ;;  %s2923_s0 = inlined_call_operand.hbm [shape: f32[2,512], index: 0, kind: input, shape index: {}]   ;;  %s2924_s1 = inlined_call_operand.hbm [shape: f32[514,128], index: 1, kind: input, shape index: {}]   ;;  %s2925_s2 = inlined_call_operand.hbm [shape: f32[129,128], index: 2, kind: input, shape index: {}]   ;;  %s2926_s3 = inlined_call_operand.hbm [shape: f32[2,128], index: 3, kind: output, shape index: {}]  }
   0x1   :  { %9 = vsyncpa [#allocation6], 0 }
   0x2   :  { %10 = vsyncpa [#allocation4], 0  ;;  %s2522_s12 = smov [#allocation5]   ;;  %s2428_s16 = scalar_lea.hbm %s2924_s1, 8320 }
   0x3   :  { %s26_s13 = sshll.u32 %s2522_s12, 4  ;;  %p2429_p0 = scmp.ne.s32.totalorder %s2924_s1, %s2428_s16  ;;  %s27_s13 = int_to_ptr.vmem [resolvable:$true] %s26_s13 }
   0x4   :  { %p2432_p1 = scmp.lt.u32.totalorder %s2428_s16, %s2924_s1 }
   0x6   :  { %p2434_p2 = pnand %p2432_p1, %p2429_p0 }
   0x8   :  { %2437 = shalt.err (!%p2434_p2)
}
   0x9   :  { %s2438_s21 = scalar_lea.vmem %s27_s13, 8320  ;;  %p2443_p4 = scmp.lt.s32.totalorder %s27_s13, %s27_s13 }
   0xa   :  { %p2439_p3 = scmp.ne.s32.totalorder %s27_s13, %s2438_s21  ;;  %p2444_p5 = scmp.lt.s32.totalorder %s2438_s21, %s2438_s21 }
   0xc   :  { %p2445_p6 = por %p2444_p5, %p2443_p4 }
   0xe   :  { %p2446_p7 = pnand %p2445_p6, %p2439_p3 }
  0x10   :  { %2449 = shalt.err (!%p2446_p7)
}
  0x11   :  { %s2523_s22 = smov 128   ;;  %s2524_s23 = smov 8  }
  0x12   :  { %32 = dma.hbm_to_vmem [thread:$0]  %s2924_s1, 8320, %s27_s13, [#allocation6], %s2523_s22, %s2523_s22, %s2524_s23  }
  0x13   :  { %s2525_s26 = smov [#allocation2]   ;;  %s2526_s28 = smov [#allocation7]  }
  0x14   :  { %s17_s27 = sshll.u32 %s2525_s26, 4  ;;  %s38_s29 = sshll.u32 %s2526_s28, 4  ;;  %s18_s27 = int_to_ptr.vmem [resolvable:$true] %s17_s27  ;;  %s39_s29 = int_to_ptr.vmem [resolvable:$true] %s38_s29 }
  0x15   :  { %s2450_s5 = scalar_lea.hbm %s2923_s0, 128 }
  0x16   :  { %p2451_p8 = scmp.ne.s32.totalorder %s2923_s0, %s2450_s5  ;;  %p2454_p9 = scmp.lt.u32.totalorder %s2450_s5, %s2923_s0 }
  0x18   :  { %p2456_p10 = pnand %p2454_p9, %p2451_p8 }
  0x1a   :  { %2459 = shalt.err (!%p2456_p10)
}
  0x1b   :  { %s2460_s1 = scalar_lea.vmem %s18_s27, 128  ;;  %p2465_p12 = scmp.lt.s32.totalorder %s18_s27, %s18_s27 }
  0x1c   :  { %p2461_p11 = scmp.ne.s32.totalorder %s18_s27, %s2460_s1  ;;  %p2466_p13 = scmp.lt.s32.totalorder %s2460_s1, %s2460_s1 }
  0x1e   :  { %p2467_p0 = por %p2466_p13, %p2465_p12 }
  0x20   :  { %p2468_p1 = pnand %p2467_p0, %p2461_p11 }
  0x22   :  { %2471 = shalt.err (!%p2468_p1)
}
  0x23   :  { %20 = dma.hbm_to_vmem [thread:$0]  %s2923_s0, 128, %s18_s27, [#allocation3]  }
  0x24   :  { %s2472_s14 = scalar_lea.hbm %s2925_s2, 2176 }
  0x25   :  { %p2473_p2 = scmp.ne.s32.totalorder %s2925_s2, %s2472_s14  ;;  %p2476_p3 = scmp.lt.u32.totalorder %s2472_s14, %s2925_s2 }
  0x27   :  { %p2478_p4 = pnand %p2476_p3, %p2473_p2 }
  0x29   :  { %2481 = shalt.err (!%p2478_p4)
}
  0x2a   :  { %s2482_s19 = scalar_lea.vmem %s39_s29, 2176  ;;  %p2487_p6 = scmp.lt.s32.totalorder %s39_s29, %s39_s29 }
  0x2b   :  { %p2483_p5 = scmp.ne.s32.totalorder %s39_s29, %s2482_s19  ;;  %p2488_p7 = scmp.lt.s32.totalorder %s2482_s19, %s2482_s19 }
  0x2d   :  { %p2489_p8 = por %p2488_p7, %p2487_p6 }
  0x2f   :  { %p2490_p9 = pnand %p2489_p8, %p2483_p5 }
  0x31   :  { %2493 = shalt.err (!%p2490_p9)
}
  0x32   :  { %44 = dma.hbm_to_vmem [thread:$0]  %s2925_s2, 2176, %s39_s29, [#allocation6], %s2523_s22, %s2523_s22, %s2524_s23  }
  0x33   :  { %2516 = dma.done.wait [#allocation3], 128  }
  0x34   :  { %2517 = vsyncadd [#allocation3], 4294967168 }
  0x35   :  { %2518 = dma.done.wait [#allocation6], 10496  }
  0x36   :  { %2519 = vsyncadd [#allocation6], 4294956800  ;;  %v2527_v0 = vmov 0.0|0.0   ;;  %vm2528_vm0 = vmmov 0   ;;  %v2529_v1 = vmov 0.0   ;;  %v54_v2 = vld [vmem:[#allocation5] sm:$0xff]  ;;  %v136_v16 = vlaneseq }
  0x37   :  { %2032 = vmatprep.subr.bf16.mxu0 %v2527_v0  ;;  %1539 = vmatprep.mubr.msk.f32.mxu0 %vm2528_vm0, %v2529_v1  ;;  %v55_v3 = vld [vmem:[#allocation5 + $0x8] sm:$0xff]  ;;  %v56_v4 = vld [vmem:[#allocation5 + $0x10] sm:$0xff]  ;;  %v57_v6 = vld [vmem:[#allocation5 + $0x18] sm:$0xff]  ;;  %v2530_v17 = vmov 1983009808   ;;  %s2531_s2 = smov [#allocation8]  }
  0x38   :  { %2056 = vmatprep.subr.bf16.mxu1 %v2527_v0  ;;  %1574 = vmatprep.mubr.msk.f32.mxu1 %vm2528_vm0, %v2529_v1  ;;  %v2600_v5 = vpack.c.bf16 %v55_v3, %v54_v2  ;;  %v2603_v7 = vpack.c.bf16 %v57_v6, %v56_v4  ;;  %v58_v8 = vld [vmem:[#allocation5 + $0x20] sm:$0xff]  ;;  %v59_v9 = vld [vmem:[#allocation5 + $0x28] sm:$0xff]  ;;  %v60_v11 = vld [vmem:[#allocation5 + $0x30] sm:$0xff]  ;;  %v217_v18 = vunpack.c.l.s4 %v2530_v17  ;;  %v2620_v22 = vshrl.u32 %v136_v16, 7  ;;  %s1241_s21 = sshll.u32 %s2531_s2, 4  ;;  %s1242_s21 = int_to_ptr.vmem [resolvable:$true] %s1241_s21 }
  0x39   :  { %v2609_v10 = vpack.c.bf16 %v59_v9, %v58_v8  ;;  %v61_v12 = vld [vmem:[#allocation5 + $0x38] sm:$0xff]  ;;  %v62_v14 = vld [vmem:[#allocation5 + $0x40] sm:$0xff]  ;;  %v63_v15 = vld [vmem:[#allocation5 + $0x48] sm:$0xff]  ;;  %s2494_s22 = scalar_lea.vmem %s1242_s21, 32  ;;  %p2499_p11 = scmp.lt.s32.totalorder %s1242_s21, %s1242_s21 }
  0x3a   :  { %2034 = vmatpush3.bf16.msra.mxu0 %v2600_v5  ;;  %2058 = vmatpush3.bf16.msra.mxu1 %v2600_v5  ;;  %v2042_v13 = vpack.c.bf16 %v61_v12, %v60_v11  ;;  %v2045_v19 = vpack.c.bf16 %v63_v15, %v62_v14  ;;  %v64_v20 = vld [vmem:[#allocation5 + $0x50] sm:$0xff]  ;;  %v65_v21 = vld [vmem:[#allocation5 + $0x58] sm:$0xff]  ;;  %v218_v23 = vunpack.c.0.s8 %v217_v18  ;;  %v66_v25 = vld [vmem:[#allocation5 + $0x60] sm:$0xff]  ;;  %p2495_p10 = scmp.ne.s32.totalorder %s1242_s21, %s2494_s22  ;;  %p2500_p12 = scmp.lt.s32.totalorder %s2494_s22, %s2494_s22 }
  0x3b   :  { %2035 = vmatprep.subr.bf16.mxu0 %v2527_v0  ;;  %2059 = vmatprep.subr.bf16.mxu1 %v2527_v0  ;;  %v2048_v24 = vpack.c.bf16 %v65_v21, %v64_v20  ;;  %v67_v26 = vld [vmem:[#allocation5 + $0x68] sm:$0xff]  ;;  %v68_v29 = vld [vmem:[#allocation5 + $0x70] sm:$0xff]  ;;  %v69_v30 = vld [vmem:[#allocation5 + $0x78] sm:$0xff] }
  0x3c   :  { %v221_v27 = vsub.s32 %v218_v23, %v2620_v22  ;;  %v2051_v28 = vpack.c.bf16 %v67_v26, %v66_v25  ;;  %v144_v31 = vld [vmem:[#allocation2] sm:$0xff]  ;;  %v2054_v33 = vpack.c.bf16 %v69_v30, %v68_v29  ;;  %v86_v37 = vld [vmem:[#allocation5 + $0x100] sm:$0xff]  ;;  %v87_v38 = vld [vmem:[#allocation5 + $0x108] sm:$0xff]  ;;  %v138_v25 = vsub.s32 0, %v2620_v22  ;;  %p2501_p13 = por %p2500_p12, %p2499_p11 }
  0x3d   :  { %v295_v35 = vcombine.high %v144_v31, %v144_v31  ;;  %v70_v39 = vld [vmem:[#allocation5 + $0x80] sm:$0xff]  ;;  %v71_v40 = vld [vmem:[#allocation5 + $0x88] sm:$0xff]  ;;  %v2655_v42 = vpack.c.bf16 %v87_v38, %v86_v37  ;;  %v88_v44 = vld [vmem:[#allocation5 + $0x110] sm:$0xff] }
  0x3e   :  { %2037 = vmatpush3.bf16.msra.mxu0 %v2603_v7  ;;  %2061 = vmatpush3.bf16.msra.mxu1 %v2603_v7  ;;  %v222_v32 = vrot.slane %v144_v31, %v221_v27  ;;  %v2657_v43 = vpack.c.bf16 %v71_v40, %v70_v39  ;;  %v89_v45 = vld [vmem:[#allocation5 + $0x118] sm:$0xff]  ;;  %v72_v46 = vld [vmem:[#allocation5 + $0x90] sm:$0xff]  ;;  %v90_v50 = vld [vmem:[#allocation5 + $0x120] sm:$0xff]  ;;  %p2502_p0 = pnand %p2501_p13, %p2495_p10 }
  0x3f   :  { %2038 = vmatprep.subr.bf16.mxu0 %v2527_v0  ;;  %2062 = vmatprep.subr.bf16.mxu1 %v2527_v0  ;;  %v302_v36 = vrot.slane %v295_v35, %v221_v27  ;;  %v73_v47 = vld [vmem:[#allocation5 + $0x98] sm:$0xff]  ;;  %v2663_v48 = vpack.c.bf16 %v89_v45, %v88_v44  ;;  %v91_v51 = vld [vmem:[#allocation5 + $0x128] sm:$0xff]  ;;  %v74_v52 = vld [vmem:[#allocation5 + $0xa0] sm:$0xff] }
  0x40   :  { %v223_v34 = vcombine.high %v222_v32, %v222_v32  ;;  %v2665_v49 = vpack.c.bf16 %v73_v47, %v72_v46  ;;  %v75_v53 = vld [vmem:[#allocation5 + $0xa8] sm:$0xff]  ;;  %v2675_v54 = vpack.c.bf16 %v91_v51, %v90_v50  ;;  %v92_v56 = vld [vmem:[#allocation5 + $0x130] sm:$0xff]  ;;  %v93_v57 = vld [vmem:[#allocation5 + $0x138] sm:$0xff] }
  0x41   :  { %v374_v41 = vcombine.high %v302_v36, %v302_v36  ;;  %v2677_v55 = vpack.c.bf16 %v75_v53, %v74_v52  ;;  %v76_v58 = vld [vmem:[#allocation5 + $0xb0] sm:$0xff]  ;;  %v77_v59 = vld [vmem:[#allocation5 + $0xb8] sm:$0xff]  ;;  %v2683_v60 = vpack.c.bf16 %v93_v57, %v92_v56  ;;  %v94_v62 = vld [vmem:[#allocation5 + $0x140] sm:$0xff] }
  0x42   :  { %2040 = vmatpush3.bf16.msra.mxu0 %v2609_v10  ;;  %2064 = vmatpush3.bf16.msra.mxu1 %v2609_v10  ;;  %v2685_v61 = vpack.c.bf16 %v77_v59, %v76_v58  ;;  %v95_v63 = vld [vmem:[#allocation5 + $0x148] sm:$0xff]  ;;  %v78_v2 = vld [vmem:[#allocation5 + $0xc0] sm:$0xff]  ;;  %v96_v6 = vld [vmem:[#allocation5 + $0x150] sm:$0xff] }
  0x43   :  { %2041 = vmatprep.subr.bf16.mxu0 %v2527_v0  ;;  %2065 = vmatprep.subr.bf16.mxu1 %v2527_v0  ;;  %v79_v3 = vld [vmem:[#allocation5 + $0xc8] sm:$0xff]  ;;  %v2691_v4 = vpack.c.bf16 %v95_v63, %v94_v62  ;;  %v80_v8 = vld [vmem:[#allocation5 + $0xd0] sm:$0xff]  ;;  %v98_v12 = vld [vmem:[#allocation5 + $0x160] sm:$0xff] }
  0x44   :  { %v82_v14 = vld [vmem:[#allocation5 + $0xe0] sm:$0xff]  ;;  %v83_v16 = vld [vmem:[#allocation5 + $0xe8] sm:$0xff]  ;;  %v100_v17 = vld [vmem:[#allocation5 + $0x170] sm:$0xff] }
  0x45   :  { %v101_v18 = vld [vmem:[#allocation5 + $0x178] sm:$0xff]  ;;  %v84_v20 = vld [vmem:[#allocation5 + $0xf0] sm:$0xff]  ;;  %v2726_v26 = vld [vmem:[#allocation5 + $0x200] sm:$0x3] }
  0x46   :  { %2043 = vmatpush3.bf16.msra.mxu0 %v2042_v13  ;;  %2067 = vmatpush3.bf16.msra.mxu1 %v2042_v13  ;;  %v85_v21 = vld [vmem:[#allocation5 + $0xf8] sm:$0xff]  ;;  %v2714_v23 = vpack.c.bf16 %v101_v18, %v100_v17  ;;  %v2729_v27 = vrot.slane %v2726_v26, %v138_v25  ;;  %v103_v32 = vld [vmem:[#allocation5 + $0x188] sm:$0xff]  ;;  %v106_v38 = vld [vmem:[#allocation5 + $0x1a0] sm:$0xff] }
  0x47   :  { %2044 = vmatprep.subr.bf16.mxu0 %v2527_v0  ;;  %2068 = vmatprep.subr.bf16.mxu1 %v2527_v0  ;;  %v105_v35 = vld [vmem:[#allocation5 + $0x198] sm:$0xff]  ;;  %v107_v39 = vld [vmem:[#allocation5 + $0x1a8] sm:$0xff]  ;;  %v110_v46 = vld [vmem:[#allocation5 + $0x1c0] sm:$0xff] }
  0x48   :  { %v2746_v40 = vpack.c.bf16 %v107_v39, %v106_v38  ;;  %v109_v44 = vld [vmem:[#allocation5 + $0x1b8] sm:$0xff]  ;;  %v111_v47 = vld [vmem:[#allocation5 + $0x1c8] sm:$0xff]  ;;  %v112_v51 = vld [vmem:[#allocation5 + $0x1d0] sm:$0xff] }
  0x49   :  { %v2758_v50 = vpack.c.bf16 %v111_v47, %v110_v46  ;;  %v113_v52 = vld [vmem:[#allocation5 + $0x1d8] sm:$0xff]  ;;  %v114_v56 = vld [vmem:[#allocation5 + $0x1e0] sm:$0xff]  ;;  %v115_v57 = vld [vmem:[#allocation5 + $0x1e8] sm:$0xff] }
  0x4a   :  { %2046 = vmatpush3.bf16.msra.mxu0 %v2045_v19  ;;  %2070 = vmatpush3.bf16.msra.mxu1 %v2045_v19  ;;  %v2772_v53 = vpack.c.bf16 %v113_v52, %v112_v51  ;;  %v116_v58 = vld [vmem:[#allocation5 + $0x1f0] sm:$0xff]  ;;  %v2776_v59 = vpack.c.bf16 %v115_v57, %v114_v56  ;;  %v117_v62 = vld [vmem:[#allocation5 + $0x1f8] sm:$0xff]  ;;  %v127_v38 = vld [vmem:[#allocation7 + $0x40] sm:$0xff] }
  0x4b   :  { %2047 = vmatprep.subr.bf16.mxu0 %v2527_v0  ;;  %2071 = vmatprep.subr.bf16.mxu1 %v2527_v0  ;;  %v2779_v63 = vpack.c.bf16 %v117_v62, %v116_v58  ;;  %v128_v39 = vld [vmem:[#allocation7 + $0x48] sm:$0xff]  ;;  %v134_v51 = vld [vmem:[#allocation7 + $0x78] sm:$0xff] }
  0x4c   :  { %v132_v46 = vld [vmem:[#allocation7 + $0x68] sm:$0xff] }
  0x4e   :  { %2049 = vmatpush3.bf16.msra.mxu0 %v2048_v24  ;;  %2073 = vmatpush3.bf16.msra.mxu1 %v2048_v24 }
  0x4f   :  { %2050 = vmatprep.subr.bf16.mxu0 %v2527_v0  ;;  %2074 = vmatprep.subr.bf16.mxu1 %v2527_v0 }
  0x52   :  { %2052 = vmatpush3.bf16.msra.mxu0 %v2051_v28  ;;  %2076 = vmatpush3.bf16.msra.mxu1 %v2051_v28 }
  0x53   :  { %2053 = vmatprep.subr.bf16.mxu0 %v2527_v0  ;;  %2077 = vmatprep.subr.bf16.mxu1 %v2527_v0 }
  0x56   :  { %2055 = vmatpush3.bf16.msra.mxu0 %v2054_v33  ;;  %2079 = vmatpush3.bf16.msra.mxu1 %v2054_v33 }
  0x57   :  { %2080 = vmatprep.subr.bf16.mxu0 %v2527_v0  ;;  %2104 = vmatprep.subr.bf16.mxu1 %v2527_v0 }
  0x59   :  { %1540 = vmatmul.mubr.f32.vlgmr.msra.gmra.mrb[0].mxu0 %v144_v31  ;;  %1575 = vmatmul.mubr.f32.vlgmr.msra.gmra.mrb[0].mxu1 %v223_v34  ;;  %v102_v31 = vld [vmem:[#allocation5 + $0x180] sm:$0xff]  ;;  %v104_v34 = vld [vmem:[#allocation5 + $0x190] sm:$0xff] }
  0x5a   :  { %2082 = vmatpush3.bf16.msra.mxu0 %v2600_v5  ;;  %2106 = vmatpush3.bf16.msra.mxu1 %v2600_v5  ;;  %v2693_v5 = vpack.c.bf16 %v79_v3, %v78_v2  ;;  %v2736_v37 = vpack.c.bf16 %v105_v35, %v104_v34  ;;  %v142_v2 = vsub.s32 1, %v2620_v22  ;;  %v124_v34 = vld [vmem:[#allocation7 + $0x28] sm:$0xff]  ;;  %v125_v35 = vld [vmem:[#allocation7 + $0x30] sm:$0xff] }
  0x5b   :  { %2083 = vmatprep.subr.bf16.mxu0 %v2527_v0  ;;  %2107 = vmatprep.subr.bf16.mxu1 %v2527_v0 }
  0x5c   :  { %1609 = vmatprep.mubr.msk.f32.mxu0 %vm2528_vm0, %v2529_v1  ;;  %1644 = vmatprep.mubr.msk.f32.mxu1 %vm2528_vm0, %v2529_v1  ;;  %v2786_v3 = vrot.slane %v2726_v26, %v142_v2  ;;  %v1251_v2 = vld [vmem:[#allocation7 + $0x80] ss:$0 sm:$0xff] }
  0x5e   :  { %2085 = vmatpush3.bf16.msra.mxu0 %v2603_v7  ;;  %2109 = vmatpush3.bf16.msra.mxu1 %v2603_v7  ;;  %v97_v7 = vld [vmem:[#allocation5 + $0x158] sm:$0xff] }
  0x5f   :  { %2086 = vmatprep.subr.bf16.mxu0 %v2527_v0  ;;  %2110 = vmatprep.subr.bf16.mxu1 %v2527_v0  ;;  %v2701_v9 = vpack.c.bf16 %v97_v7, %v96_v6 }
  0x62   :  { %2088 = vmatpush3.bf16.msra.mxu0 %v2609_v10  ;;  %2112 = vmatpush3.bf16.msra.mxu1 %v2609_v10  ;;  %v81_v10 = vld [vmem:[#allocation5 + $0xd8] sm:$0xff] }
  0x63   :  { %2089 = vmatprep.subr.bf16.mxu0 %v2527_v0  ;;  %2113 = vmatprep.subr.bf16.mxu1 %v2527_v0  ;;  %v2703_v11 = vpack.c.bf16 %v81_v10, %v80_v8 }
  0x66   :  { %2091 = vmatpush3.bf16.msra.mxu0 %v2042_v13  ;;  %2115 = vmatpush3.bf16.msra.mxu1 %v2042_v13  ;;  %v99_v13 = vld [vmem:[#allocation5 + $0x168] sm:$0xff] }
  0x67   :  { %2092 = vmatprep.subr.bf16.mxu0 %v2527_v0  ;;  %2116 = vmatprep.subr.bf16.mxu1 %v2527_v0  ;;  %v2708_v15 = vpack.c.bf16 %v99_v13, %v98_v12 }
  0x6a   :  { %2094 = vmatpush3.bf16.msra.mxu0 %v2045_v19  ;;  %2118 = vmatpush3.bf16.msra.mxu1 %v2045_v19  ;;  %v2711_v19 = vpack.c.bf16 %v83_v16, %v82_v14 }
  0x6b   :  { %2095 = vmatprep.subr.bf16.mxu0 %v2527_v0  ;;  %2119 = vmatprep.subr.bf16.mxu1 %v2527_v0 }
  0x6e   :  { %2097 = vmatpush3.bf16.msra.mxu0 %v2048_v24  ;;  %2121 = vmatpush3.bf16.msra.mxu1 %v2048_v24  ;;  %v2718_v24 = vpack.c.bf16 %v85_v21, %v84_v20 }
  0x6f   :  { %2098 = vmatprep.subr.bf16.mxu0 %v2527_v0  ;;  %2122 = vmatprep.subr.bf16.mxu1 %v2527_v0 }
  0x72   :  { %2100 = vmatpush3.bf16.msra.mxu0 %v2051_v28  ;;  %2124 = vmatpush3.bf16.msra.mxu1 %v2051_v28 }
  0x73   :  { %2101 = vmatprep.subr.bf16.mxu0 %v2527_v0  ;;  %2125 = vmatprep.subr.bf16.mxu1 %v2527_v0 }
  0x76   :  { %2103 = vmatpush3.bf16.msra.mxu0 %v2054_v33  ;;  %2127 = vmatpush3.bf16.msra.mxu1 %v2054_v33  ;;  %v2732_v33 = vpack.c.bf16 %v103_v32, %v102_v31 }
  0x77   :  { %2128 = vmatprep.subr.bf16.mxu0 %v2527_v0  ;;  %2152 = vmatprep.subr.bf16.mxu1 %v2527_v0 }
  0x79   :  { %1610 = vmatmul.mubr.f32.vlgmr.msra.gmra.mrb[2].mxu0 %v302_v36  ;;  %1645 = vmatmul.mubr.f32.vlgmr.msra.gmra.mrb[2].mxu1 %v374_v41  ;;  %v108_v41 = vld [vmem:[#allocation5 + $0x1b0] sm:$0xff] }
  0x7a   :  { %2130 = vmatpush3.bf16.msra.mxu0 %v2655_v42  ;;  %2154 = vmatpush3.bf16.msra.mxu1 %v2657_v43  ;;  %v2752_v45 = vpack.c.bf16 %v109_v44, %v108_v41  ;;  %v130_v41 = vld [vmem:[#allocation7 + $0x58] sm:$0xff] }
  0x7b   :  { %2131 = vmatprep.subr.bf16.mxu0 %v2527_v0  ;;  %2155 = vmatprep.subr.bf16.mxu1 %v2527_v0 }
  0x7c   :  { %1679 = vmatprep.mubr.msk.f32.mxu0 %vm2528_vm0, %v2529_v1  ;;  %1714 = vmatprep.mubr.msk.f32.mxu1 %vm2528_vm0, %v2529_v1 }
  0x7e   :  { %2133 = vmatpush3.bf16.msra.mxu0 %v2663_v48  ;;  %2157 = vmatpush3.bf16.msra.mxu1 %v2665_v49 }
  0x7f   :  { %2134 = vmatprep.subr.bf16.mxu0 %v2527_v0  ;;  %2158 = vmatprep.subr.bf16.mxu1 %v2527_v0 }
  0x82   :  { %2136 = vmatpush3.bf16.msra.mxu0 %v2675_v54  ;;  %2160 = vmatpush3.bf16.msra.mxu1 %v2677_v55 }
  0x83   :  { %2137 = vmatprep.subr.bf16.mxu0 %v2527_v0  ;;  %2161 = vmatprep.subr.bf16.mxu1 %v2527_v0 }
  0x86   :  { %2139 = vmatpush3.bf16.msra.mxu0 %v2683_v60  ;;  %2163 = vmatpush3.bf16.msra.mxu1 %v2685_v61 }
  0x87   :  { %2140 = vmatprep.subr.bf16.mxu0 %v2527_v0  ;;  %2164 = vmatprep.subr.bf16.mxu1 %v2527_v0 }
  0x8a   :  { %2142 = vmatpush3.bf16.msra.mxu0 %v2691_v4  ;;  %2166 = vmatpush3.bf16.msra.mxu1 %v2693_v5 }
  0x8b   :  { %2143 = vmatprep.subr.bf16.mxu0 %v2527_v0  ;;  %2167 = vmatprep.subr.bf16.mxu1 %v2527_v0 }
  0x8e   :  { %2145 = vmatpush3.bf16.msra.mxu0 %v2701_v9  ;;  %2169 = vmatpush3.bf16.msra.mxu1 %v2703_v11 }
  0x8f   :  { %2146 = vmatprep.subr.bf16.mxu0 %v2527_v0  ;;  %2170 = vmatprep.subr.bf16.mxu1 %v2527_v0 }
  0x92   :  { %2148 = vmatpush3.bf16.msra.mxu0 %v2708_v15  ;;  %2172 = vmatpush3.bf16.msra.mxu1 %v2711_v19 }
  0x93   :  { %2149 = vmatprep.subr.bf16.mxu0 %v2527_v0  ;;  %2173 = vmatprep.subr.bf16.mxu1 %v2527_v0 }
  0x96   :  { %2151 = vmatpush3.bf16.msra.mxu0 %v2714_v23  ;;  %2175 = vmatpush3.bf16.msra.mxu1 %v2718_v24 }
  0x97   :  { %2176 = vmatprep.subr.bf16.mxu0 %v2527_v0  ;;  %2200 = vmatprep.subr.bf16.mxu1 %v2527_v0 }
 0x12c   :  { %v211_v28 = vpop.f32.mrb[0].mxu0 }
 0x12d   :  { %v212_v29 = vadd.f32 %v211_v28, %v2729_v27  ;;  %v1541_v30 = vpop.f32.mrb[1].mxu0 }
 0x12e   :  { %v122_v30 = vld [vmem:[#allocation7 + $0x18] sm:$0xff] }
 0x12f   :  { %2412 = vtanh.f32 %v212_v29 }
 0x139   :  { %v2413_v36 = vpop.eup %2412 }
 0x13a   :  { %1680 = vmatmul.mubr.f32.vlgmr.msra.gmra.mrb[4].mxu0 %v2413_v36  ;;  %1715 = vmatmul.mubr.f32.vlgmr.msra.gmra.mrb[0].mxu1 %v2413_v36  ;;  %v126_v36 = vld [vmem:[#allocation7 + $0x38] sm:$0xff] }
 0x13b   :  { %2178 = vmatpush3.bf16.msra.mxu0 %v2732_v33  ;;  %2202 = vmatpush3.bf16.msra.mxu1 %v2655_v42 }
 0x13c   :  { %2179 = vmatprep.subr.bf16.mxu0 %v2527_v0  ;;  %2203 = vmatprep.subr.bf16.mxu1 %v2527_v0 }
 0x13d   :  { %1749 = vmatprep.mubr.msk.f32.mxu0 %vm2528_vm0, %v2529_v1  ;;  %1784 = vmatprep.mubr.msk.f32.mxu1 %vm2528_vm0, %v2529_v1 }
 0x13f   :  { %2181 = vmatpush3.bf16.msra.mxu0 %v2736_v37  ;;  %2205 = vmatpush3.bf16.msra.mxu1 %v2663_v48 }
 0x140   :  { %2182 = vmatprep.subr.bf16.mxu0 %v2527_v0  ;;  %2206 = vmatprep.subr.bf16.mxu1 %v2527_v0 }
 0x143   :  { %2184 = vmatpush3.bf16.msra.mxu0 %v2746_v40  ;;  %2208 = vmatpush3.bf16.msra.mxu1 %v2675_v54 }
 0x144   :  { %2185 = vmatprep.subr.bf16.mxu0 %v2527_v0  ;;  %2209 = vmatprep.subr.bf16.mxu1 %v2527_v0 }
 0x147   :  { %2187 = vmatpush3.bf16.msra.mxu0 %v2752_v45  ;;  %2211 = vmatpush3.bf16.msra.mxu1 %v2683_v60 }
 0x148   :  { %2188 = vmatprep.subr.bf16.mxu0 %v2527_v0  ;;  %2212 = vmatprep.subr.bf16.mxu1 %v2527_v0 }
 0x14b   :  { %2190 = vmatpush3.bf16.msra.mxu0 %v2758_v50  ;;  %2214 = vmatpush3.bf16.msra.mxu1 %v2691_v4 }
 0x14c   :  { %2191 = vmatprep.subr.bf16.mxu0 %v2527_v0  ;;  %2215 = vmatprep.subr.bf16.mxu1 %v2527_v0 }
 0x14f   :  { %2217 = vmatpush3.bf16.msra.mxu1 %v2701_v9  ;;  %2193 = vmatpush3.bf16.msra.mxu0 %v2772_v53 }
 0x150   :  { %2218 = vmatprep.subr.bf16.mxu1 %v2527_v0  ;;  %2194 = vmatprep.subr.bf16.mxu0 %v2527_v0 }
 0x153   :  { %2220 = vmatpush3.bf16.msra.mxu1 %v2708_v15  ;;  %2196 = vmatpush3.bf16.msra.mxu0 %v2776_v59 }
 0x154   :  { %2221 = vmatprep.subr.bf16.mxu1 %v2527_v0  ;;  %2197 = vmatprep.subr.bf16.mxu0 %v2527_v0 }
 0x157   :  { %2223 = vmatpush3.bf16.msra.mxu1 %v2714_v23  ;;  %2199 = vmatpush3.bf16.msra.mxu0 %v2779_v63 }
 0x158   :  { %2248 = vmatprep.subr.bf16.mxu1 %v2527_v0  ;;  %2224 = vmatprep.subr.bf16.mxu0 %v2527_v0 }
 0x20d   :  { %v513_v6 = vpop.f32.mrb[4].mxu0  ;;  %v584_v7 = vpop.f32.mrb[0].mxu1 }
 0x20e   :  { %v514_v8 = vadd.f32 %v513_v6, %v2786_v3  ;;  %v2392_v10 = vadd.f32 %v584_v7, %v2729_v27  ;;  %v1681_v12 = vpop.f32.mrb[5].mxu0  ;;  %v1716_v13 = vpop.f32.mrb[1].mxu1 }
 0x210   :  { %2414 = vtanh.f32 %v514_v8 }
 0x211   :  { %2416 = vtanh.f32 %v2392_v10 }
 0x21a   :  { %v2415_v14 = vpop.eup %2414 }
 0x21b   :  { %v2417_v16 = vpop.eup %2416  ;;  %1750 = vmatmul.mubr.f32.vlgmr.msra.gmra.mrb[6].mxu0 %v2415_v14 }
 0x21c   :  { %1785 = vmatmul.mubr.f32.vlgmr.msra.gmra.mrb[4].mxu1 %v2417_v16  ;;  %2226 = vmatpush3.bf16.msra.mxu0 %v2657_v43 }
 0x21d   :  { %2227 = vmatprep.subr.bf16.mxu0 %v2527_v0  ;;  %1819 = vmatprep.mubr.msk.f32.mxu0 %vm2528_vm0, %v2529_v1 }
 0x21e   :  { %2250 = vmatpush3.bf16.msra.mxu1 %v2732_v33  ;;  %1854 = vmatprep.mubr.msk.f32.mxu1 %vm2528_vm0, %v2529_v1 }
 0x21f   :  { %2251 = vmatprep.subr.bf16.mxu1 %v2527_v0 }
 0x220   :  { %2229 = vmatpush3.bf16.msra.mxu0 %v2665_v49 }
 0x221   :  { %2230 = vmatprep.subr.bf16.mxu0 %v2527_v0 }
 0x222   :  { %2253 = vmatpush3.bf16.msra.mxu1 %v2736_v37 }
 0x223   :  { %2254 = vmatprep.subr.bf16.mxu1 %v2527_v0 }
 0x224   :  { %2232 = vmatpush3.bf16.msra.mxu0 %v2677_v55 }
 0x225   :  { %2233 = vmatprep.subr.bf16.mxu0 %v2527_v0 }
 0x226   :  { %2256 = vmatpush3.bf16.msra.mxu1 %v2746_v40 }
 0x227   :  { %2257 = vmatprep.subr.bf16.mxu1 %v2527_v0 }
 0x228   :  { %2235 = vmatpush3.bf16.msra.mxu0 %v2685_v61 }
 0x229   :  { %2236 = vmatprep.subr.bf16.mxu0 %v2527_v0 }
 0x22a   :  { %2259 = vmatpush3.bf16.msra.mxu1 %v2752_v45 }
 0x22b   :  { %2260 = vmatprep.subr.bf16.mxu1 %v2527_v0 }
 0x22c   :  { %2238 = vmatpush3.bf16.msra.mxu0 %v2693_v5 }
 0x22d   :  { %2239 = vmatprep.subr.bf16.mxu0 %v2527_v0 }
 0x22e   :  { %2262 = vmatpush3.bf16.msra.mxu1 %v2758_v50 }
 0x22f   :  { %2263 = vmatprep.subr.bf16.mxu1 %v2527_v0 }
 0x230   :  { %2241 = vmatpush3.bf16.msra.mxu0 %v2703_v11 }
 0x231   :  { %2242 = vmatprep.subr.bf16.mxu0 %v2527_v0 }
 0x232   :  { %2265 = vmatpush3.bf16.msra.mxu1 %v2772_v53 }
 0x233   :  { %2266 = vmatprep.subr.bf16.mxu1 %v2527_v0 }
 0x234   :  { %2244 = vmatpush3.bf16.msra.mxu0 %v2711_v19 }
 0x235   :  { %2245 = vmatprep.subr.bf16.mxu0 %v2527_v0 }
 0x236   :  { %2268 = vmatpush3.bf16.msra.mxu1 %v2776_v59 }
 0x237   :  { %2269 = vmatprep.subr.bf16.mxu1 %v2527_v0 }
 0x238   :  { %2247 = vmatpush3.bf16.msra.mxu0 %v2718_v24 }
 0x239   :  { %2272 = vmatprep.subr.bf16.mxu0 %v2527_v0 }
 0x23a   :  { %2271 = vmatpush3.bf16.msra.mxu1 %v2779_v63 }
 0x23b   :  { %1820 = vmatmul.mubr.f32.vlgmr.msra.gmra.mrb[2].mxu0 %v2417_v16  ;;  %2296 = vmatprep.subr.bf16.mxu1 %v2527_v0 }
 0x23c   :  { %2274 = vmatpush3.bf16.msra.mxu0 %v2655_v42  ;;  %1889 = vmatprep.mubr.msk.f32.mxu0 %vm2528_vm0, %v2529_v1 }
 0x23d   :  { %2275 = vmatprep.subr.bf16.mxu0 %v2527_v0 }
 0x240   :  { %2277 = vmatpush3.bf16.msra.mxu0 %v2663_v48 }
 0x241   :  { %2278 = vmatprep.subr.bf16.mxu0 %v2527_v0 }
 0x244   :  { %2280 = vmatpush3.bf16.msra.mxu0 %v2675_v54 }
 0x245   :  { %2281 = vmatprep.subr.bf16.mxu0 %v2527_v0 }
 0x248   :  { %2283 = vmatpush3.bf16.msra.mxu0 %v2683_v60 }
 0x249   :  { %2284 = vmatprep.subr.bf16.mxu0 %v2527_v0 }
 0x24c   :  { %2286 = vmatpush3.bf16.msra.mxu0 %v2691_v4 }
 0x24d   :  { %2287 = vmatprep.subr.bf16.mxu0 %v2527_v0 }
 0x250   :  { %2289 = vmatpush3.bf16.msra.mxu0 %v2701_v9 }
 0x251   :  { %2290 = vmatprep.subr.bf16.mxu0 %v2527_v0 }
 0x254   :  { %2292 = vmatpush3.bf16.msra.mxu0 %v2708_v15 }
 0x255   :  { %2293 = vmatprep.subr.bf16.mxu0 %v2527_v0 }
 0x258   :  { %2295 = vmatpush3.bf16.msra.mxu0 %v2714_v23 }
 0x259   :  { %2320 = vmatprep.subr.bf16.mxu0 %v2527_v0 }
 0x2ee   :  { %v656_v22 = vpop.f32.mrb[6].mxu0 }
 0x2ef   :  { %v726_v17 = vpop.f32.mrb[4].mxu1  ;;  %v1751_v18 = vpop.f32.mrb[7].mxu0 }
 0x2f0   :  { %v727_v20 = vadd.f32 %v726_v17, %v656_v22  ;;  %v1786_v21 = vpop.f32.mrb[5].mxu1 }
 0x2f2   :  { %v730_v25 = vadd.f32 %v727_v20, %v2786_v3 }
 0x2f4   :  { %2418 = vtanh.f32 %v730_v25 }
 0x2fe   :  { %v2419_v26 = vpop.eup %2418 }
 0x2ff   :  { %1855 = vmatmul.mubr.f32.vlgmr.msra.gmra.mrb[6].mxu1 %v2419_v26 }
 0x300   :  { %2298 = vmatpush3.bf16.msra.mxu1 %v2657_v43  ;;  %1924 = vmatprep.mubr.msk.f32.mxu1 %vm2528_vm0, %v2529_v1 }
 0x301   :  { %2299 = vmatprep.subr.bf16.mxu1 %v2527_v0 }
 0x304   :  { %2301 = vmatpush3.bf16.msra.mxu1 %v2665_v49 }
 0x305   :  { %2302 = vmatprep.subr.bf16.mxu1 %v2527_v0 }
 0x308   :  { %2304 = vmatpush3.bf16.msra.mxu1 %v2677_v55 }
 0x309   :  { %2305 = vmatprep.subr.bf16.mxu1 %v2527_v0 }
 0x30c   :  { %2307 = vmatpush3.bf16.msra.mxu1 %v2685_v61 }
 0x30d   :  { %2308 = vmatprep.subr.bf16.mxu1 %v2527_v0 }
 0x30e   :  { %v798_v28 = vpop.f32.mrb[2].mxu0 }
 0x30f   :  { %v2393_v43 = vadd.f32 %v798_v28, %v2729_v27  ;;  %v1821_v29 = vpop.f32.mrb[3].mxu0 }
 0x310   :  { %2310 = vmatpush3.bf16.msra.mxu1 %v2693_v5 }
 0x311   :  { %2420 = vtanh.f32 %v2393_v43  ;;  %2311 = vmatprep.subr.bf16.mxu1 %v2527_v0 }
 0x314   :  { %2313 = vmatpush3.bf16.msra.mxu1 %v2703_v11  ;;  %v119_v11 = vld [vmem:[#allocation7] sm:$0xff] }
 0x315   :  { %2314 = vmatprep.subr.bf16.mxu1 %v2527_v0 }
 0x318   :  { %2316 = vmatpush3.bf16.msra.mxu1 %v2711_v19 }
 0x319   :  { %2317 = vmatprep.subr.bf16.mxu1 %v2527_v0 }
 0x31b   :  { %v2421_v49 = vpop.eup %2420 }
 0x31c   :  { %2319 = vmatpush3.bf16.msra.mxu1 %v2718_v24  ;;  %1890 = vmatmul.mubr.f32.vlgmr.msra.gmra.mrb[8].mxu0 %v2421_v49  ;;  %v121_v24 = vld [vmem:[#allocation7 + $0x10] sm:$0xff] }
 0x31d   :  { %2344 = vmatprep.subr.bf16.mxu1 %v2527_v0  ;;  %2322 = vmatpush3.bf16.msra.mxu0 %v2732_v33  ;;  %v2372_v32 = vpack.c.bf16 %v122_v30, %v121_v24  ;;  %v123_v33 = vld [vmem:[#allocation7 + $0x20] sm:$0xff] }
 0x31e   :  { %2323 = vmatprep.subr.bf16.mxu0 %v2527_v0  ;;  %1959 = vmatprep.mubr.msk.f32.mxu0 %vm2528_vm0, %v2529_v1 }
 0x31f   :  { %1925 = vmatmul.mubr.f32.vlgmr.msra.gmra.mrb[2].mxu1 %v2421_v49 }
 0x320   :  { %2346 = vmatpush3.bf16.msra.mxu1 %v2655_v42  ;;  %1994 = vmatprep.mubr.msk.f32.mxu1 %vm2528_vm0, %v2529_v1 }
 0x321   :  { %2347 = vmatprep.subr.bf16.mxu1 %v2527_v0  ;;  %2325 = vmatpush3.bf16.msra.mxu0 %v2736_v37  ;;  %v2378_v37 = vpack.c.bf16 %v126_v36, %v125_v35 }
 0x322   :  { %2326 = vmatprep.subr.bf16.mxu0 %v2527_v0 }
 0x324   :  { %2349 = vmatpush3.bf16.msra.mxu1 %v2663_v48 }
 0x325   :  { %2350 = vmatprep.subr.bf16.mxu1 %v2527_v0  ;;  %2328 = vmatpush3.bf16.msra.mxu0 %v2746_v40  ;;  %v2381_v40 = vpack.c.bf16 %v128_v39, %v127_v38 }
 0x326   :  { %2329 = vmatprep.subr.bf16.mxu0 %v2527_v0 }
 0x328   :  { %2352 = vmatpush3.bf16.msra.mxu1 %v2675_v54 }
 0x329   :  { %2353 = vmatprep.subr.bf16.mxu1 %v2527_v0  ;;  %2331 = vmatpush3.bf16.msra.mxu0 %v2752_v45  ;;  %v131_v45 = vld [vmem:[#allocation7 + $0x60] sm:$0xff] }
 0x32a   :  { %2332 = vmatprep.subr.bf16.mxu0 %v2527_v0  ;;  %v2387_v47 = vpack.c.bf16 %v132_v46, %v131_v45 }
 0x32c   :  { %2355 = vmatpush3.bf16.msra.mxu1 %v2683_v60 }
 0x32d   :  { %2356 = vmatprep.subr.bf16.mxu1 %v2527_v0  ;;  %2334 = vmatpush3.bf16.msra.mxu0 %v2758_v50  ;;  %v133_v50 = vld [vmem:[#allocation7 + $0x70] sm:$0xff] }
 0x32e   :  { %2335 = vmatprep.subr.bf16.mxu0 %v2527_v0  ;;  %v2390_v52 = vpack.c.bf16 %v134_v51, %v133_v50 }
 0x330   :  { %2358 = vmatpush3.bf16.msra.mxu1 %v2691_v4 }
 0x331   :  { %2359 = vmatprep.subr.bf16.mxu1 %v2527_v0  ;;  %2337 = vmatpush3.bf16.msra.mxu0 %v2772_v53 }
 0x332   :  { %2338 = vmatprep.subr.bf16.mxu0 %v2527_v0 }
 0x334   :  { %2361 = vmatpush3.bf16.msra.mxu1 %v2701_v9 }
 0x335   :  { %2362 = vmatprep.subr.bf16.mxu1 %v2527_v0  ;;  %2340 = vmatpush3.bf16.msra.mxu0 %v2776_v59 }
 0x336   :  { %2341 = vmatprep.subr.bf16.mxu0 %v2527_v0 }
 0x338   :  { %2364 = vmatpush3.bf16.msra.mxu1 %v2708_v15  ;;  %v120_v15 = vld [vmem:[#allocation7 + $0x8] sm:$0xff] }
 0x339   :  { %2365 = vmatprep.subr.bf16.mxu1 %v2527_v0  ;;  %2343 = vmatpush3.bf16.msra.mxu0 %v2779_v63  ;;  %v2369_v19 = vpack.c.bf16 %v120_v15, %v119_v11 }
 0x33a   :  { %2368 = vmatprep.subr.bf16.mxu0 %v2527_v0 }
 0x33c   :  { %2367 = vmatpush3.bf16.msra.mxu1 %v2714_v23 }
 0x3d2   :  { %v870_v42 = vpop.f32.mrb[6].mxu1 }
 0x3d3   :  { %v1856_v48 = vpop.f32.mrb[7].mxu1 }
 0x3ef   :  { %v940_v54 = vpop.f32.mrb[8].mxu0 }
 0x3f0   :  { %v941_v55 = vadd.f32 %v940_v54, %v870_v42  ;;  %v1891_v60 = vpop.f32.mrb[9].mxu0 }
 0x3f2   :  { %v944_v61 = vadd.f32 %v941_v55, %v2786_v3  ;;  %v1012_v4 = vpop.f32.mrb[2].mxu1 }
 0x3f3   :  { %v2394_v5 = vadd.f32 %v1012_v4, %v2729_v27  ;;  %v1926_v9 = vpop.f32.mrb[3].mxu1  ;;  %v2375_v27 = vpack.c.bf16 %v124_v34, %v123_v33 }
 0x3f4   :  { %2422 = vtanh.f32 %v944_v61 }
 0x3f5   :  { %2424 = vtanh.f32 %v2394_v5 }
 0x3fe   :  { %v2423_v31 = vpop.eup %2422 }
 0x3ff   :  { %v2425_v23 = vpop.eup %2424  ;;  %1960 = vmatmul.mubr.f32.vlgmr.msra.gmra.mrb[10].mxu0 %v2423_v31 }
 0x400   :  { %1995 = vmatmul.mubr.f32.vlgmr.msra.gmra.mrb[8].mxu1 %v2425_v23  ;;  %2370 = vmatpush3.bf16.msra.mxu0 %v2369_v19 }
 0x401   :  { %2371 = vmatprep.subr.bf16.mxu0 %v2527_v0  ;;  %2029 = vmatprep.mubr.msk.f32.mxu0 %vm2528_vm0, %v2529_v1  ;;  %v129_v1 = vld [vmem:[#allocation7 + $0x50] sm:$0xff] }
 0x402   :  { %v2384_v44 = vpack.c.bf16 %v130_v41, %v129_v1 }
 0x404   :  { %2373 = vmatpush3.bf16.msra.mxu0 %v2372_v32 }
 0x405   :  { %2374 = vmatprep.subr.bf16.mxu0 %v2527_v0 }
 0x408   :  { %2376 = vmatpush3.bf16.msra.mxu0 %v2375_v27 }
 0x409   :  { %2377 = vmatprep.subr.bf16.mxu0 %v2527_v0 }
 0x40c   :  { %2379 = vmatpush3.bf16.msra.mxu0 %v2378_v37 }
 0x40d   :  { %2380 = vmatprep.subr.bf16.mxu0 %v2527_v0 }
 0x410   :  { %2382 = vmatpush3.bf16.msra.mxu0 %v2381_v40 }
 0x411   :  { %2383 = vmatprep.subr.bf16.mxu0 %v2527_v0 }
 0x414   :  { %2385 = vmatpush3.bf16.msra.mxu0 %v2384_v44 }
 0x415   :  { %2386 = vmatprep.subr.bf16.mxu0 %v2527_v0 }
 0x418   :  { %2388 = vmatpush3.bf16.msra.mxu0 %v2387_v47 }
 0x419   :  { %2389 = vmatprep.subr.bf16.mxu0 %v2527_v0 }
 0x41c   :  { %2391 = vmatpush3.bf16.msra.mxu0 %v2390_v52 }
 0x4d2   :  { %v1084_v53 = vpop.f32.mrb[10].mxu0 }
 0x4d3   :  { %v1154_v56 = vpop.f32.mrb[8].mxu1  ;;  %v1961_v57 = vpop.f32.mrb[11].mxu0 }
 0x4d4   :  { %v1155_v58 = vadd.f32 %v1154_v56, %v1084_v53  ;;  %v1996_v59 = vpop.f32.mrb[9].mxu1 }
 0x4d6   :  { %v1158_v62 = vadd.f32 %v1155_v58, %v2786_v3 }
 0x4d8   :  { %2426 = vtanh.f32 %v1158_v62 }
 0x4e2   :  { %v2427_v63 = vpop.eup %2426 }
 0x4e3   :  { %2030 = vmatmul.mubr.f32.vlgmr.msra.gmra.mrb[12].mxu0 %v2427_v63 }
 0x5b6   :  { %v1230_v6 = vpop.f32.mrb[12].mxu0 }
 0x5b7   :  { %v1231_v7 = vadd.f32 %v1251_v2, %v1230_v6  ;;  %v2031_v8 = vpop.f32.mrb[13].mxu0 }
 0x5b9   :  { %1234 = vst [vmem:[#allocation8] sm:$0x3] %v1231_v7 }
 0x5ba   :  { %2505 = shalt.err (!%p2502_p0)
}
 0x5bb   :  { %s2506_s25 = scalar_lea.hbm %s2926_s3, 32 }
 0x5bc   :  { %p2507_p1 = scmp.ne.s32.totalorder %s2926_s3, %s2506_s25  ;;  %p2510_p2 = scmp.lt.u32.totalorder %s2506_s25, %s2926_s3 }
 0x5be   :  { %p2512_p3 = pnand %p2510_p2, %p2507_p1 }
 0x5c0   :  { %2515 = shalt.err (!%p2512_p3)
}
 0x5c1   :  { %1244 = dma.vmem_to_hbm [thread:$0]  %s1242_s21, 32, %s2926_s3, [#allocation4]  }
 0x5c2   :  { %2520 = dma.done.wait [#allocation4], 32  }
 0x5c3   :  { %2521 = vsyncadd [#allocation4], 4294967264 }
 0x5c4   :  { %1248 = vsyncpa [#allocation3], 1 }
 0x5c5   :  { %1249 = vsyncpa [#allocation6], 1 }
 0x5c6   :  { %1250 = vsyncpa [#allocation4], 1 }

</bundles_post_ra>
